<compile_context>
chip_gen: v7x
topology: tpu7x:2x2x1
jax: 0.10.0
libtpu: 0.0.40
codegen_flags: <defaults>
</compile_context>

<pallas_src>
import jax
import jax.numpy as jnp
from jax.experimental import pallas as pl
from jax.experimental.pallas import tpu as pltpu

LANE = 128  # TPU lane width; only the *output* feature dim is padded to this.


def _round_up(n, m):
    return ((n + m - 1) // m) * m


def _pick_tile_b(batch):
    """Largest batch tile that still leaves >= 2 grid steps when possible."""
    for t in (512, 256, 128, 64, 32, 16, 8):
        if batch >= 2 * t:
            return t
    return 8


# -----------------------------------------------------------------------------
# Kernel factory: fused 6-layer MLP forward on one (TILE_B, dinput) batch tile.
# -----------------------------------------------------------------------------
def make_dqn_kernel(dims, offsets):
    """dims: list of (K, N) per layer (N of last layer already lane-padded).
    offsets: static row offsets of each layer's weight inside the packed slab.
    """
    n_layers = len(dims)

    def kernel(x_ref, w_ref, b_ref, o_ref):
        # x tile: (TILE_B, dinput) f32 -> bf16 MXU operand (cast in-kernel).
        h = x_ref[...].astype(jnp.bfloat16)
        for li in range(n_layers):            # statically unrolled (6 layers)
            k, n = dims[li]
            r0 = offsets[li]
            w = w_ref[r0:r0 + k, 0:n]          # static slice of resident slab
            acc = jnp.dot(h, w, preferred_element_type=jnp.float32)
            acc = acc + b_ref[li:li + 1, 0:n]  # f32 bias on f32 accumulator
            if li < n_layers - 1:
                h = jnp.maximum(acc, 0.0).astype(jnp.bfloat16)
            else:
                o_ref[...] = acc.astype(o_ref.dtype)

    return kernel


# -----------------------------------------------------------------------------
# Parameter packing: one bf16 weight slab + one f32 bias slab (done once).
# -----------------------------------------------------------------------------
def pack_params(params):
    """params: list of (w (K,N) f32, b (1,N) f32) with natural layer dims.

    Returns a dict with:
      w_slab  : (total_K, max_N) bf16, layers stacked along K (16-row aligned)
      b_slab  : (n_layers, max_N) f32
      dims    : per-layer (K, N_effective) with the last N padded to LANE
      offsets : per-layer row offset into w_slab
      dout_pad, doutput
    """
    n_layers = len(params)
    doutput = params[-1][0].shape[1]
    dout_pad = _round_up(doutput, LANE)

    dims, offsets = [], []
    r = 0
    max_n = 0
    for i, (w, _) in enumerate(params):
        k, n = w.shape
        n_eff = dout_pad if i == n_layers - 1 else n
        dims.append((k, n_eff))
        offsets.append(r)
        r += _round_up(k, 16)          # keep bf16 sublane-tile alignment
        max_n = max(max_n, n_eff)
    total_k = r

    w_slab = jnp.zeros((total_k, max_n), jnp.float32)
    b_slab = jnp.zeros((n_layers, max_n), jnp.float32)
    for i, (w, b) in enumerate(params):
        k, n = w.shape
        w_slab = w_slab.at[offsets[i]:offsets[i] + k, 0:n].set(w)
        b_slab = b_slab.at[i:i + 1, 0:n].set(b.reshape(1, n))

    return dict(
        w_slab=w_slab.astype(jnp.bfloat16),
        b_slab=b_slab,
        dims=dims,
        offsets=offsets,
        dout_pad=dout_pad,
        doutput=doutput,
    )


# -----------------------------------------------------------------------------
# Forward wrapper
# -----------------------------------------------------------------------------
def dqn_forward(x, packed):
    """x: (B, dinput) f32.  packed: output of pack_params."""
    B, dinput = x.shape
    dims = packed["dims"]
    assert dims[0][0] == dinput, "x feature dim must match first layer"
    dout_pad = packed["dout_pad"]
    doutput = packed["doutput"]

    tile_b = _pick_tile_b(B)
    b_pad = _round_up(B, tile_b)
    if b_pad != B:
        # Tiny batch-only pad (f32, dinput wide) -- no lane padding here.
        x = jnp.pad(x, ((0, b_pad - B), (0, 0)))

    grid = (b_pad // tile_b,)
    kernel = make_dqn_kernel(dims, packed["offsets"])

    out_padded = pl.pallas_call(
        kernel,
        out_shape=jax.ShapeDtypeStruct((b_pad, dout_pad), jnp.float32),
        grid=grid,
        in_specs=[
            # batch-tiled activations (last dim == full array dim -> legal)
            pl.BlockSpec((tile_b, dinput), lambda i: (i, 0)),
            # VMEM-resident packed weights / biases (same block every step)
            pl.BlockSpec(packed["w_slab"].shape, lambda i: (0, 0)),
            pl.BlockSpec(packed["b_slab"].shape, lambda i: (0, 0)),
        ],
        out_specs=pl.BlockSpec((tile_b, dout_pad), lambda i: (i, 0)),
        compiler_params=pltpu.CompilerParams(
            dimension_semantics=("parallel",),   # shard batch tiles over TCs
            # no vmem_limit_bytes: real footprint ~1-2 MiB, defaults suffice
        ),
    )(x, packed["w_slab"], packed["b_slab"])

    # Strip batch padding and padded output lanes.
    return out_padded[:B, :doutput]


# -----------------------------------------------------------------------------
# Init + references
# -----------------------------------------------------------------------------
def init_params(key, dinput, doutput):
    """Deterministic synthetic init (Kaiming-uniform-like scale), f32."""
    layer_sizes = [dinput, 32, 64, 128, 256, 256, doutput]
    params = []
    for i in range(len(layer_sizes) - 1):
        fan_in, fan_out = layer_sizes[i], layer_sizes[i + 1]
        key, kw, kb = jax.random.split(key, 3)
        bound = 1.0 / jnp.sqrt(jnp.float32(fan_in))
        w = jax.random.uniform(kw, (fan_in, fan_out), jnp.float32, -bound, bound)
        b = jax.random.uniform(kb, (1, fan_out), jnp.float32, -bound, bound)
        params.append((w, b))
    return params


def dqn_reference_f32(x, params):
    """Pure-f32 reference (full precision, mirrors the PyTorch forward)."""
    h = x
    n = len(params)
    for i, (w, b) in enumerate(params):
        h = jnp.dot(h, w, precision=jax.lax.Precision.HIGHEST) + b
        if i < n - 1:
            h = jnp.maximum(h, 0.0)
    return h


def dqn_reference_bf16(x, params):
    """Reference mirroring the kernel's bf16-operand / f32-accumulate math."""
    h = x.astype(jnp.bfloat16)
    n = len(params)
    for i, (w, b) in enumerate(params):
        acc = jnp.dot(h.astype(jnp.float32),
                      w.astype(jnp.bfloat16).astype(jnp.float32),
                      precision=jax.lax.Precision.HIGHEST) + b
        if i < n - 1:
            acc = jnp.maximum(acc, 0.0)
            h = acc.astype(jnp.bfloat16)
        else:
            h = acc
    return h


if __name__ == "__main__":
    key = jax.random.PRNGKey(0)

    batch = 8
    dinput = 16
    doutput = 4

    key, kx = jax.random.split(key)
    x = jax.random.normal(kx, (batch, dinput), dtype=jnp.float32)

    params = init_params(key, dinput, doutput)
    packed = pack_params(params)

    out = dqn_forward(x, packed)
    out = jax.block_until_ready(out)
    assert out.shape == (batch, doutput)

    # Tight check vs. a reference that mirrors the kernel's bf16/f32 math.
    ref_bf16 = dqn_reference_bf16(x, params)
    assert jnp.allclose(out, ref_bf16, atol=2e-3, rtol=2e-3), \
        "mismatch vs bf16-faithful reference"

    # Loose check vs. the pure-f32 PyTorch-equivalent forward (bf16 rounding).
    ref_f32 = dqn_reference_f32(x, params)
    assert jnp.allclose(out, ref_f32, atol=5e-2, rtol=5e-2), \
        "mismatch vs f32 reference"

    print("KERNEL_OK")
</pallas_src>

<mosaic_0001>
module attributes {stable_mosaic.version = 11 : i64} {
  func.func @kernel(%arg0: i32, %arg1: memref<8x16xf32, #tpu.memory_space<vmem>>, %arg2: memref<752x256xbf16, #tpu.memory_space<vmem>>, %arg3: memref<6x256xf32, #tpu.memory_space<vmem>>, %arg4: memref<8x128xf32, #tpu.memory_space<vmem>>) attributes {dimension_semantics = [#tpu.dimension_semantics<parallel>], iteration_bounds = array<i64: 1>, scalar_prefetch = 0 : i64, scratch_operands = 0 : i64, tpu.core_type = #tpu.core_type<tc>, window_params = [{transform_indices = @transform_0, window_bounds = array<i64: 8, 16>}, {pipeline_mode = #tpu.pipeline_mode<synchronous>, transform_indices = @transform_1, window_bounds = array<i64: 752, 256>}, {pipeline_mode = #tpu.pipeline_mode<synchronous>, transform_indices = @transform_2, window_bounds = array<i64: 6, 256>}, {transform_indices = @transform_3, window_bounds = array<i64: 8, 128>}]} {
    %c0 = arith.constant 0 : index
    %c0_0 = arith.constant 0 : index
    %0 = vector.load %arg1[%c0, %c0_0] : memref<8x16xf32, #tpu.memory_space<vmem>>, vector<8x16xf32>
    %1 = arith.truncf %0 : vector<8x16xf32> to vector<8x16xbf16>
    %c0_1 = arith.constant 0 : index
    %c0_2 = arith.constant 0 : index
    %2 = vector.load %arg2[%c0_1, %c0_2] : memref<752x256xbf16, #tpu.memory_space<vmem>>, vector<16x32xbf16>
    %cst = arith.constant dense<0.000000e+00> : vector<8x32xf32>
    %3 = tpu.matmul %1, %2, %cst {dimension_numbers = #tpu.dot_dimension_numbers<[1], [0], [0], [1], [0, 0, 1, 1], [], []>} : vector<8x16xbf16>, vector<16x32xbf16>, vector<8x32xf32> -> vector<8x32xf32>
    %c0_3 = arith.constant 0 : index
    %c0_4 = arith.constant 0 : index
    %4 = vector.load %arg3[%c0_3, %c0_4] : memref<6x256xf32, #tpu.memory_space<vmem>>, vector<1x32xf32>
    %5 = vector.broadcast %4 : vector<1x32xf32> to vector<8x32xf32>
    %6 = arith.addf %3, %5 : vector<8x32xf32>
    %cst_5 = arith.constant 0.000000e+00 : f32
    %7 = vector.broadcast %cst_5 : f32 to vector<8x32xf32>
    %8 = arith.maximumf %6, %7 : vector<8x32xf32>
    %9 = arith.truncf %8 : vector<8x32xf32> to vector<8x32xbf16>
    %c16 = arith.constant 16 : index
    %c0_6 = arith.constant 0 : index
    %10 = vector.load %arg2[%c16, %c0_6] : memref<752x256xbf16, #tpu.memory_space<vmem>>, vector<32x64xbf16>
    %cst_7 = arith.constant dense<0.000000e+00> : vector<8x64xf32>
    %11 = tpu.matmul %9, %10, %cst_7 {dimension_numbers = #tpu.dot_dimension_numbers<[1], [0], [0], [1], [0, 0, 1, 1], [], []>} : vector<8x32xbf16>, vector<32x64xbf16>, vector<8x64xf32> -> vector<8x64xf32>
    %c1 = arith.constant 1 : index
    %c0_8 = arith.constant 0 : index
    %12 = vector.load %arg3[%c1, %c0_8] : memref<6x256xf32, #tpu.memory_space<vmem>>, vector<1x64xf32>
    %13 = vector.broadcast %12 : vector<1x64xf32> to vector<8x64xf32>
    %14 = arith.addf %11, %13 : vector<8x64xf32>
    %cst_9 = arith.constant 0.000000e+00 : f32
    %15 = vector.broadcast %cst_9 : f32 to vector<8x64xf32>
    %16 = arith.maximumf %14, %15 : vector<8x64xf32>
    %17 = arith.truncf %16 : vector<8x64xf32> to vector<8x64xbf16>
    %c48 = arith.constant 48 : index
    %c0_10 = arith.constant 0 : index
    %18 = vector.load %arg2[%c48, %c0_10] : memref<752x256xbf16, #tpu.memory_space<vmem>>, vector<64x128xbf16>
    %cst_11 = arith.constant dense<0.000000e+00> : vector<8x128xf32>
    %19 = tpu.matmul %17, %18, %cst_11 {dimension_numbers = #tpu.dot_dimension_numbers<[1], [0], [0], [1], [0, 0, 1, 1], [], []>} : vector<8x64xbf16>, vector<64x128xbf16>, vector<8x128xf32> -> vector<8x128xf32>
    %c2 = arith.constant 2 : index
    %c0_12 = arith.constant 0 : index
    %20 = vector.load %arg3[%c2, %c0_12] : memref<6x256xf32, #tpu.memory_space<vmem>>, vector<1x128xf32>
    %21 = vector.broadcast %20 : vector<1x128xf32> to vector<8x128xf32>
    %22 = arith.addf %19, %21 : vector<8x128xf32>
    %cst_13 = arith.constant 0.000000e+00 : f32
    %23 = vector.broadcast %cst_13 : f32 to vector<8x128xf32>
    %24 = arith.maximumf %22, %23 : vector<8x128xf32>
    %25 = arith.truncf %24 : vector<8x128xf32> to vector<8x128xbf16>
    %c112 = arith.constant 112 : index
    %c0_14 = arith.constant 0 : index
    %26 = vector.load %arg2[%c112, %c0_14] : memref<752x256xbf16, #tpu.memory_space<vmem>>, vector<128x256xbf16>
    %cst_15 = arith.constant dense<0.000000e+00> : vector<8x256xf32>
    %27 = tpu.matmul %25, %26, %cst_15 {dimension_numbers = #tpu.dot_dimension_numbers<[1], [0], [0], [1], [0, 0, 1, 1], [], []>} : vector<8x128xbf16>, vector<128x256xbf16>, vector<8x256xf32> -> vector<8x256xf32>
    %c3 = arith.constant 3 : index
    %c0_16 = arith.constant 0 : index
    %28 = vector.load %arg3[%c3, %c0_16] : memref<6x256xf32, #tpu.memory_space<vmem>>, vector<1x256xf32>
    %29 = vector.broadcast %28 : vector<1x256xf32> to vector<8x256xf32>
    %30 = arith.addf %27, %29 : vector<8x256xf32>
    %cst_17 = arith.constant 0.000000e+00 : f32
    %31 = vector.broadcast %cst_17 : f32 to vector<8x256xf32>
    %32 = arith.maximumf %30, %31 : vector<8x256xf32>
    %33 = arith.truncf %32 : vector<8x256xf32> to vector<8x256xbf16>
    %c240 = arith.constant 240 : index
    %c0_18 = arith.constant 0 : index
    %34 = vector.load %arg2[%c240, %c0_18] : memref<752x256xbf16, #tpu.memory_space<vmem>>, vector<256x256xbf16>
    %cst_19 = arith.constant dense<0.000000e+00> : vector<8x256xf32>
    %35 = tpu.matmul %33, %34, %cst_19 {dimension_numbers = #tpu.dot_dimension_numbers<[1], [0], [0], [1], [0, 0, 1, 1], [], []>} : vector<8x256xbf16>, vector<256x256xbf16>, vector<8x256xf32> -> vector<8x256xf32>
    %c4 = arith.constant 4 : index
    %c0_20 = arith.constant 0 : index
    %36 = vector.load %arg3[%c4, %c0_20] : memref<6x256xf32, #tpu.memory_space<vmem>>, vector<1x256xf32>
    %37 = vector.broadcast %36 : vector<1x256xf32> to vector<8x256xf32>
    %38 = arith.addf %35, %37 : vector<8x256xf32>
    %cst_21 = arith.constant 0.000000e+00 : f32
    %39 = vector.broadcast %cst_21 : f32 to vector<8x256xf32>
    %40 = arith.maximumf %38, %39 : vector<8x256xf32>
    %41 = arith.truncf %40 : vector<8x256xf32> to vector<8x256xbf16>
    %c496 = arith.constant 496 : index
    %c0_22 = arith.constant 0 : index
    %42 = vector.load %arg2[%c496, %c0_22] : memref<752x256xbf16, #tpu.memory_space<vmem>>, vector<256x128xbf16>
    %cst_23 = arith.constant dense<0.000000e+00> : vector<8x128xf32>
    %43 = tpu.matmul %41, %42, %cst_23 {dimension_numbers = #tpu.dot_dimension_numbers<[1], [0], [0], [1], [0, 0, 1, 1], [], []>} : vector<8x256xbf16>, vector<256x128xbf16>, vector<8x128xf32> -> vector<8x128xf32>
    %c5 = arith.constant 5 : index
    %c0_24 = arith.constant 0 : index
    %44 = vector.load %arg3[%c5, %c0_24] : memref<6x256xf32, #tpu.memory_space<vmem>>, vector<1x128xf32>
    %45 = vector.broadcast %44 : vector<1x128xf32> to vector<8x128xf32>
    %46 = arith.addf %43, %45 : vector<8x128xf32>
    %c0_25 = arith.constant 0 : index
    %c0_26 = arith.constant 0 : index
    %47 = vector.load %arg4[%c0_25, %c0_26] : memref<8x128xf32, #tpu.memory_space<vmem>>, vector<8x128xf32>
    tpu.vector_store %arg4[%c0_25, %c0_26], %46 {strides = array<i32>} : memref<8x128xf32, #tpu.memory_space<vmem>>, vector<8x128xf32>,
    return
  }
  func.func @transform_0(%arg0: i32) -> (i32, i32) {
    %c0_i32 = arith.constant 0 : i32
    %c0_i32_0 = arith.constant 0 : i32
    return %arg0, %c0_i32 : i32, i32
  }
  func.func @transform_1(%arg0: i32) -> (i32, i32) {
    %c0_i32 = arith.constant 0 : i32
    %c0_i32_0 = arith.constant 0 : i32
    %c0_i32_1 = arith.constant 0 : i32
    return %c0_i32, %c0_i32_0 : i32, i32
  }
  func.func @transform_2(%arg0: i32) -> (i32, i32) {
    %c0_i32 = arith.constant 0 : i32
    %c0_i32_0 = arith.constant 0 : i32
    %c0_i32_1 = arith.constant 0 : i32
    return %c0_i32, %c0_i32_0 : i32, i32
  }
  func.func @transform_3(%arg0: i32) -> (i32, i32) {
    %c0_i32 = arith.constant 0 : i32
    %c0_i32_0 = arith.constant 0 : i32
    return %arg0, %c0_i32 : i32, i32
  }
}

</mosaic_0001>

<bundles_post_ra>
// kernel: tpu_custom_call.1
= control target key start
LH: loop header
LB: loop body
LE: loop exit
PB: predicated region body
PF: predicated region fallthrough
CT: control target
= control target key end

     0   :  { %8 = vsyncpa [#allocation3], 0  ;;  %s1249_s0 = inlined_call_operand.hbm [shape: f32[8,16], index: 0, kind: input, shape index: {}]   ;;  %s1250_s1 = inlined_call_operand.hbm [shape: bf16[752,256], index: 1, kind: input, shape index: {}]   ;;  %s1251_s2 = inlined_call_operand.hbm [shape: f32[6,256], index: 2, kind: input, shape index: {}]   ;;  %s1252_s3 = inlined_call_operand.hbm [shape: f32[8,128], index: 3, kind: output, shape index: {}]  }
   0x1   :  { %9 = vsyncpa [#allocation6], 0 }
   0x2   :  { %10 = vsyncpa [#allocation4], 0  ;;  %s1172_s12 = smov [#allocation5]   ;;  %s1078_s16 = scalar_lea.hbm %s1250_s1, 12032 }
   0x3   :  { %s26_s13 = sshll.u32 %s1172_s12, 4  ;;  %p1079_p0 = scmp.ne.s32.totalorder %s1250_s1, %s1078_s16  ;;  %s27_s13 = int_to_ptr.vmem [resolvable:$true] %s26_s13 }
   0x4   :  { %p1082_p1 = scmp.lt.u32.totalorder %s1078_s16, %s1250_s1 }
   0x6   :  { %p1084_p2 = pnand %p1082_p1, %p1079_p0 }
   0x8   :  { %1087 = shalt.err (!%p1084_p2)
}
   0x9   :  { %s1088_s21 = scalar_lea.vmem %s27_s13, 12032  ;;  %p1093_p4 = scmp.lt.s32.totalorder %s27_s13, %s27_s13 }
   0xa   :  { %p1089_p3 = scmp.ne.s32.totalorder %s27_s13, %s1088_s21  ;;  %p1094_p5 = scmp.lt.s32.totalorder %s1088_s21, %s1088_s21 }
   0xc   :  { %p1095_p6 = por %p1094_p5, %p1093_p4 }
   0xe   :  { %p1096_p7 = pnand %p1095_p6, %p1089_p3 }
  0x10   :  { %1099 = shalt.err (!%p1096_p7)
}
  0x11   :  { %s1173_s22 = smov 128   ;;  %s1174_s23 = smov 8  }
  0x12   :  { %32 = dma.hbm_to_vmem [thread:$0]  %s1250_s1, 12032, %s27_s13, [#allocation6], %s1173_s22, %s1173_s22, %s1174_s23  }
  0x13   :  { %s1175_s26 = smov [#allocation2]   ;;  %s1176_s28 = smov [#allocation7]  }
  0x14   :  { %s17_s27 = sshll.u32 %s1175_s26, 4  ;;  %s39_s29 = sshll.u32 %s1176_s28, 4  ;;  %s18_s27 = int_to_ptr.vmem [resolvable:$true] %s17_s27  ;;  %s40_s29 = int_to_ptr.vmem [resolvable:$true] %s39_s29 }
  0x15   :  { %s1100_s5 = scalar_lea.hbm %s1249_s0, 128 }
  0x16   :  { %p1101_p8 = scmp.ne.s32.totalorder %s1249_s0, %s1100_s5  ;;  %p1104_p9 = scmp.lt.u32.totalorder %s1100_s5, %s1249_s0 }
  0x18   :  { %p1106_p10 = pnand %p1104_p9, %p1101_p8 }
  0x1a   :  { %1109 = shalt.err (!%p1106_p10)
}
  0x1b   :  { %s1110_s1 = scalar_lea.vmem %s18_s27, 128  ;;  %p1115_p12 = scmp.lt.s32.totalorder %s18_s27, %s18_s27 }
  0x1c   :  { %p1111_p11 = scmp.ne.s32.totalorder %s18_s27, %s1110_s1  ;;  %p1116_p13 = scmp.lt.s32.totalorder %s1110_s1, %s1110_s1 }
  0x1e   :  { %p1117_p0 = por %p1116_p13, %p1115_p12 }
  0x20   :  { %p1118_p1 = pnand %p1117_p0, %p1111_p11 }
  0x22   :  { %1121 = shalt.err (!%p1118_p1)
}
  0x23   :  { %20 = dma.hbm_to_vmem [thread:$0]  %s1249_s0, 128, %s18_s27, [#allocation3]  }
  0x24   :  { %s1122_s14 = scalar_lea.hbm %s1251_s2, 256 }
  0x25   :  { %p1123_p2 = scmp.ne.s32.totalorder %s1251_s2, %s1122_s14  ;;  %p1126_p3 = scmp.lt.u32.totalorder %s1122_s14, %s1251_s2 }
  0x27   :  { %p1128_p4 = pnand %p1126_p3, %p1123_p2 }
  0x29   :  { %1131 = shalt.err (!%p1128_p4)
}
  0x2a   :  { %s1132_s19 = scalar_lea.vmem %s40_s29, 256  ;;  %p1137_p6 = scmp.lt.s32.totalorder %s40_s29, %s40_s29 }
  0x2b   :  { %p1133_p5 = scmp.ne.s32.totalorder %s40_s29, %s1132_s19  ;;  %p1138_p7 = scmp.lt.s32.totalorder %s1132_s19, %s1132_s19 }
  0x2d   :  { %p1139_p8 = por %p1138_p7, %p1137_p6 }
  0x2f   :  { %p1140_p9 = pnand %p1139_p8, %p1133_p5 }
  0x31   :  { %1143 = shalt.err (!%p1140_p9)
}
  0x32   :  { %42 = dma.hbm_to_vmem [thread:$0]  %s1251_s2, 256, %s40_s29, [#allocation6]  }
  0x33   :  { %1166 = dma.done.wait [#allocation3], 128  }
  0x34   :  { %1167 = vsyncadd [#allocation3], 4294967168 }
  0x35   :  { %1168 = dma.done.wait [#allocation6], 12288  }
  0x36   :  { %1169 = vsyncadd [#allocation6], 4294955008  ;;  %v1177_v0 = vmov 0.0   ;;  %vm1178_vm0 = vmmov 0   ;;  %v983_v1 = vld [vmem:[#allocation5] ss:$8 sps:$4 sm:$0xff]  }
  0x37   :  { %948 = vmatprep.subr.bf16.mxu1 %v1177_v0  ;;  %950 = vmatprep.mubr.msk.bf16.mxu1 %vm1178_vm0, %v1177_v0  ;;  %v53_v2 = vld [vmem:[#allocation2] sm:$0xff]  ;;  %vm64_vm1 = vcmask 130048   ;;  %v985_v5 = vld [vmem:[#allocation5 + $0x20] ss:$8 sps:$4 sm:$0xff]   ;;  %v57_v8 = vld [vmem:[#allocation7] ss:$0 sm:$0xff] }
  0x38   :  { %962 = vmatprep.subr.bf16.mxu0 %v1177_v0  ;;  %970 = vmatprep.mubr.msk.bf16.mxu0 %vm1178_vm0, %v1177_v0  ;;  %v54_v3 = vpack.c.bf16 %v53_v2, %v53_v2  ;;  %v984_v4 = vld [vmem:[#allocation5 + $0x10] ss:$8 sps:$4 sm:$0xff]   ;;  %v987_v7 = vld [vmem:[#allocation5 + $0x40] ss:$8 sps:$4 sm:$0xff]   ;;  %vm127_vm2 = vcmask 261120   ;;  %vm206_vm3 = vcmask 523264  }
  0x39   :  { %949 = vmatpush3.bf16.msra.mxu1 %v983_v1  ;;  %v986_v6 = vld [vmem:[#allocation5 + $0x30] ss:$8 sps:$4 sm:$0xff]   ;;  %v989_v17 = vld [vmem:[#allocation5 + $0x60] ss:$8 sps:$4 sm:$0xff]   ;;  %v992_v19 = vld [vmem:[#allocation5 + $0x74] ss:$8 sps:$4 sm:$0xff]  }
  0x3a   :  { %954 = vmatprep.subr.bf16.mxu1 %v1177_v0  ;;  %963 = vmatpush3.bf16.msra.mxu0 %v986_v6  ;;  %v988_v16 = vld [vmem:[#allocation5 + $0x50] ss:$8 sps:$4 sm:$0xff]   ;;  %v995_v20 = vld [vmem:[#allocation5 + $0x84] ss:$8 sps:$4 sm:$0xff]   ;;  %v993_v21 = vld [vmem:[#allocation5 + $0x80] ss:$8 sps:$4 sm:$0xff]  }
  0x3b   :  { %964 = vmatprep.subr.bf16.mxu0 %v1177_v0  ;;  %v990_v18 = vld [vmem:[#allocation5 + $0x70] ss:$8 sps:$4 sm:$0xff]   ;;  %v998_v22 = vld [vmem:[#allocation5 + $0x94] ss:$8 sps:$4 sm:$0xff]   ;;  %v1001_v24 = vld [vmem:[#allocation5 + $0xa4] ss:$8 sps:$4 sm:$0xff]  }
  0x3c   :  { %951 = vmatmul.mubr.msk.bf16.vlgmr.msra.gmra.mrb[0].mxu1 %vm64_vm1, %v54_v3  ;;  %v996_v23 = vld [vmem:[#allocation5 + $0x90] ss:$8 sps:$4 sm:$0xff]   ;;  %v999_v25 = vld [vmem:[#allocation5 + $0xa0] ss:$8 sps:$4 sm:$0xff]   ;;  %v1004_v26 = vld [vmem:[#allocation5 + $0xb4] ss:$8 sps:$4 sm:$0xff]  }
  0x3d   :  { %955 = vmatpush3.bf16.msra.mxu1 %v984_v4  ;;  %958 = vmatprep.mubr.msk.bf16.mxu1 %vm1178_vm0, %v1177_v0  ;;  %v1002_v27 = vld [vmem:[#allocation5 + $0xb0] ss:$8 sps:$4 sm:$0xff]   ;;  %v1007_v28 = vld [vmem:[#allocation5 + $0xc4] ss:$8 sps:$4 sm:$0xff]   ;;  %v1005_v29 = vld [vmem:[#allocation5 + $0xc0] ss:$8 sps:$4 sm:$0xff]  }
  0x3e   :  { %956 = vmatprep.subr.bf16.mxu1 %v1177_v0  ;;  %965 = vmatpush3.bf16.msra.mxu0 %v987_v7  ;;  %v1010_v30 = vld [vmem:[#allocation5 + $0xd4] ss:$8 sps:$4 sm:$0xff]   ;;  %v1008_v31 = vld [vmem:[#allocation5 + $0xd0] ss:$8 sps:$4 sm:$0xff]   ;;  %v1013_v40 = vld [vmem:[#allocation5 + $0xe4] ss:$8 sps:$4 sm:$0xff]  }
  0x3f   :  { %966 = vmatprep.subr.bf16.mxu0 %v1177_v0  ;;  %v114_v32 = vld [vmem:[#allocation7 + $0x1] ss:$0 sm:$0xff]  ;;  %v1011_v41 = vld [vmem:[#allocation5 + $0xe0] ss:$8 sps:$4 sm:$0xff]   ;;  %v1179_v42 = vmov 0   ;;  %s1180_s2 = smov [#allocation8]  }
  0x40   :  { %v1014_v43 = vld [vmem:[#allocation5 + $0xf0] ss:$8 sps:$4 sm:$0xff]   ;;  %v1016_v44 = vld [vmem:[#allocation5 + $0xf4] ss:$8 sps:$4 sm:$0xff]   ;;  %v1019_v45 = vld [vmem:[#allocation5 + $0x104] ss:$8 sps:$4 sm:$0xff]  }
  0x41   :  { %957 = vmatpush3.bf16.msra.mxu1 %v985_v5  ;;  %v1017_v46 = vld [vmem:[#allocation5 + $0x100] ss:$8 sps:$4 sm:$0xff]   ;;  %v1022_v47 = vld [vmem:[#allocation5 + $0x114] ss:$8 sps:$4 sm:$0xff]   ;;  %v1020_v48 = vld [vmem:[#allocation5 + $0x110] ss:$8 sps:$4 sm:$0xff]  }
  0x42   :  { %967 = vmatpush3.bf16.msra.mxu0 %v988_v16  ;;  %361 = vmatprep.subr.bf16.mxu1 %v992_v19  ;;  %v1025_v49 = vld [vmem:[#allocation5 + $0x124] ss:$8 sps:$4 sm:$0xff]   ;;  %v1023_v50 = vld [vmem:[#allocation5 + $0x120] ss:$8 sps:$4 sm:$0xff]   ;;  %v1028_v51 = vld [vmem:[#allocation5 + $0x134] ss:$8 sps:$4 sm:$0xff]  }
  0x43   :  { %968 = vmatprep.subr.bf16.mxu0 %v1177_v0  ;;  %v1026_v52 = vld [vmem:[#allocation5 + $0x130] ss:$8 sps:$4 sm:$0xff]   ;;  %v1031_v53 = vld [vmem:[#allocation5 + $0x144] ss:$8 sps:$4 sm:$0xff]   ;;  %v1029_v54 = vld [vmem:[#allocation5 + $0x140] ss:$8 sps:$4 sm:$0xff]  }
  0x44   :  { %v1034_v55 = vld [vmem:[#allocation5 + $0x154] ss:$8 sps:$4 sm:$0xff]   ;;  %v1032_v56 = vld [vmem:[#allocation5 + $0x150] ss:$8 sps:$4 sm:$0xff]   ;;  %v1037_v57 = vld [vmem:[#allocation5 + $0x164] ss:$8 sps:$4 sm:$0xff]  }
  0x45   :  { %v1035_v58 = vld [vmem:[#allocation5 + $0x160] ss:$8 sps:$4 sm:$0xff]   ;;  %v1040_v59 = vld [vmem:[#allocation5 + $0x174] ss:$8 sps:$4 sm:$0xff]   ;;  %v1038_v60 = vld [vmem:[#allocation5 + $0x170] ss:$8 sps:$4 sm:$0xff]  }
  0x46   :  { %969 = vmatpush3.bf16.msra.mxu0 %v989_v17  ;;  %v1043_v61 = vld [vmem:[#allocation5 + $0x184] ss:$8 sps:$4 sm:$0xff]   ;;  %v1041_v62 = vld [vmem:[#allocation5 + $0x180] ss:$8 sps:$4 sm:$0xff]   ;;  %v1046_v63 = vld [vmem:[#allocation5 + $0x194] ss:$8 sps:$4 sm:$0xff]  }
  0x47   :  { %611 = vmatprep.subr.bf16.mxu0 %v1016_v44  ;;  %v1044_v0 = vld [vmem:[#allocation5 + $0x190] ss:$8 sps:$4 sm:$0xff]   ;;  %v1049_v1 = vld [vmem:[#allocation5 + $0x1a4] ss:$8 sps:$4 sm:$0xff]   ;;  %v1047_v2 = vld [vmem:[#allocation5 + $0x1a0] ss:$8 sps:$4 sm:$0xff]  }
  0x48   :  { %v1052_v3 = vld [vmem:[#allocation5 + $0x1b4] ss:$8 sps:$4 sm:$0xff]   ;;  %v1050_v4 = vld [vmem:[#allocation5 + $0x1b0] ss:$8 sps:$4 sm:$0xff]   ;;  %v1055_v5 = vld [vmem:[#allocation5 + $0x1c4] ss:$8 sps:$4 sm:$0xff]  }
  0x49   :  { %v1053_v6 = vld [vmem:[#allocation5 + $0x1c0] ss:$8 sps:$4 sm:$0xff]   ;;  %v181_v7 = vld [vmem:[#allocation7 + $0x2] ss:$0 sm:$0xff]  ;;  %v1061_v17 = vld [vmem:[#allocation5 + $0x1e4] ss:$8 sps:$4 sm:$0xff]  }
  0x4a   :  { %v1056_v16 = vld [vmem:[#allocation5 + $0x1d0] ss:$8 sps:$4 sm:$0xff]   ;;  %s832_s21 = sshll.u32 %s1180_s2, 4  ;;  %s833_s21 = int_to_ptr.vmem [resolvable:$true] %s832_s21 }
  0x4b   :  { %v1062_v19 = vld [vmem:[#allocation5 + $0x270] ss:$8 sps:$4 sm:$0xff]   ;;  %s1144_s22 = scalar_lea.vmem %s833_s21, 128  ;;  %p1149_p11 = scmp.lt.s32.totalorder %s833_s21, %s833_s21 }
  0x4c   :  { %p1145_p10 = scmp.ne.s32.totalorder %s833_s21, %s1144_s22  ;;  %p1150_p12 = scmp.lt.s32.totalorder %s1144_s22, %s1144_s22 }
  0x4e   :  { %p1151_p13 = por %p1150_p12, %p1149_p11 }
  0x50   :  { %p1152_p0 = pnand %p1151_p13, %p1145_p10 }
 0x10f   :  { %v102_v9 = vpop.f32.mrb[0].mxu1 }
 0x110   :  { %v103_v10 = vadd.f32 %v102_v9, %v57_v8  ;;  %v952_v11 = vpop.f32.mrb[1].mxu1 }
 0x111   :  { %v105_v12 = vpop.f32.mrb[2].mxu1 }
 0x112   :  { %v108_v13 = vmax.f32 %v103_v10, 0.0  ;;  %v953_v14 = vpop.f32.mrb[3].mxu1 }
 0x114   :  { %v109_v15 = vpack.c.bf16 %v108_v13, %v108_v13 }
 0x116   :  { %959 = vmatmul.mubr.msk.bf16.vlgmr.msra.gmra.mrb[4].mxu1 %vm127_vm2, %v109_v15  ;;  %v1058_v15 = vld [vmem:[#allocation5 + $0x1d4] ss:$8 sps:$4 sm:$0xff]  }
 0x117   :  { %362 = vmatpush1.bf16.msra.mxu1 %v990_v18  ;;  %393 = vmatprep.mubr.bf16.mxu1 %v1179_v42  ;;  %v1059_v18 = vld [vmem:[#allocation5 + $0x1e0] ss:$8 sps:$4 sm:$0xff]  }
 0x118   :  { %363 = vmatprep.subr.bf16.mxu1 %v995_v20  ;;  %v1063_v20 = vld [vmem:[#allocation5 + $0x1f0] ss:$8 sps:$4 sm:$0xff]  }
 0x11b   :  { %364 = vmatpush1.bf16.msra.mxu1 %v993_v21  ;;  %v1064_v21 = vld [vmem:[#allocation5 + $0x280] ss:$8 sps:$4 sm:$0xff]  }
 0x11c   :  { %365 = vmatprep.subr.bf16.mxu1 %v998_v22  ;;  %v1065_v22 = vld [vmem:[#allocation5 + $0x200] ss:$8 sps:$4 sm:$0xff]  }
 0x11f   :  { %366 = vmatpush1.bf16.msra.mxu1 %v996_v23  ;;  %v1066_v23 = vld [vmem:[#allocation5 + $0x290] ss:$8 sps:$4 sm:$0xff]  }
 0x120   :  { %367 = vmatprep.subr.bf16.mxu1 %v1001_v24  ;;  %v1067_v24 = vld [vmem:[#allocation5 + $0x210] ss:$8 sps:$4 sm:$0xff]  }
 0x123   :  { %368 = vmatpush1.bf16.msra.mxu1 %v999_v25  ;;  %v1068_v25 = vld [vmem:[#allocation5 + $0x2a0] ss:$8 sps:$4 sm:$0xff]  }
 0x124   :  { %369 = vmatprep.subr.bf16.mxu1 %v1004_v26  ;;  %v1069_v26 = vld [vmem:[#allocation5 + $0x220] ss:$8 sps:$4 sm:$0xff]  }
 0x127   :  { %370 = vmatpush1.bf16.msra.mxu1 %v1002_v27  ;;  %v1070_v27 = vld [vmem:[#allocation5 + $0x2b0] ss:$8 sps:$4 sm:$0xff]  }
 0x128   :  { %371 = vmatprep.subr.bf16.mxu1 %v1007_v28  ;;  %v1071_v28 = vld [vmem:[#allocation5 + $0x230] ss:$8 sps:$4 sm:$0xff]  }
 0x12b   :  { %372 = vmatpush1.bf16.msra.mxu1 %v1005_v29  ;;  %v1072_v29 = vld [vmem:[#allocation5 + $0x2c0] ss:$8 sps:$4 sm:$0xff]  }
 0x12c   :  { %373 = vmatprep.subr.bf16.mxu1 %v1010_v30  ;;  %v1073_v30 = vld [vmem:[#allocation5 + $0x240] ss:$8 sps:$4 sm:$0xff]  }
 0x12f   :  { %374 = vmatpush1.bf16.msra.mxu1 %v1008_v31  ;;  %v271_v31 = vlaneseq }
 0x130   :  { %375 = vmatprep.subr.bf16.mxu1 %v1013_v40 }
 0x133   :  { %376 = vmatpush1.bf16.msra.mxu1 %v1011_v41 }
 0x134   :  { %926 = vmatprep.subr.bf16.mxu1 %v1062_v19 }
 0x1e9   :  { %v165_v33 = vpop.f32.mrb[4].mxu1 }
 0x1ea   :  { %v166_v34 = vadd.f32 %v165_v33, %v114_v32  ;;  %v960_v35 = vpop.f32.mrb[5].mxu1  ;;  %v272_v32 = vshrl.u32 %v271_v31, 7 }
 0x1eb   :  { %v168_v36 = vpop.f32.mrb[6].mxu1 }
 0x1ec   :  { %v171_v37 = vmax.f32 %v166_v34, 0.0  ;;  %v961_v38 = vpop.f32.mrb[7].mxu1  ;;  %v273_v33 = vsub.s32 0, %v272_v32  ;;  %v269_v34 = vld [vmem:[#allocation7 + $0x3] ss:$8 sm:$0x3] }
 0x1ed   :  { %v277_v35 = vsub.s32 1, %v272_v32 }
 0x1ee   :  { %v172_v39 = vpack.c.bf16 %v171_v37, %v171_v37  ;;  %v274_v36 = vrot.slane %v269_v34, %v273_v33 }
 0x1ef   :  { %v278_v37 = vrot.slane %v269_v34, %v277_v35 }
 0x1f0   :  { %971 = vmatmul.mubr.msk.bf16.vlgmr.msra.gmra.mrb[0].mxu0 %vm206_vm3, %v172_v39 }
 0x1f1   :  { %612 = vmatpush1.bf16.msra.mxu0 %v1014_v43 }
 0x1f2   :  { %613 = vmatprep.subr.bf16.mxu0 %v1019_v45 }
 0x1f5   :  { %614 = vmatpush1.bf16.msra.mxu0 %v1017_v46 }
 0x1f6   :  { %615 = vmatprep.subr.bf16.mxu0 %v1022_v47 }
 0x1f9   :  { %616 = vmatpush1.bf16.msra.mxu0 %v1020_v48  ;;  %v1074_v48 = vld [vmem:[#allocation5 + $0x2d0] ss:$8 sps:$4 sm:$0xff]  }
 0x1fa   :  { %617 = vmatprep.subr.bf16.mxu0 %v1025_v49  ;;  %v1075_v49 = vld [vmem:[#allocation5 + $0x250] ss:$8 sps:$4 sm:$0xff]  }
 0x1fd   :  { %618 = vmatpush1.bf16.msra.mxu0 %v1023_v50  ;;  %v1076_v50 = vld [vmem:[#allocation5 + $0x2e0] ss:$8 sps:$4 sm:$0xff]  }
 0x1fe   :  { %619 = vmatprep.subr.bf16.mxu0 %v1028_v51  ;;  %v1077_v51 = vld [vmem:[#allocation5 + $0x260] ss:$8 sps:$4 sm:$0xff]  }
 0x201   :  { %620 = vmatpush1.bf16.msra.mxu0 %v1026_v52  ;;  %v439_v52 = vld [vmem:[#allocation7 + $0x4] ss:$8 sm:$0x3] }
 0x202   :  { %621 = vmatprep.subr.bf16.mxu0 %v1031_v53  ;;  %v444_v53 = vrot.slane %v439_v52, %v273_v33 }
 0x205   :  { %622 = vmatpush1.bf16.msra.mxu0 %v1029_v54  ;;  %v448_v54 = vrot.slane %v439_v52, %v277_v35 }
 0x206   :  { %623 = vmatprep.subr.bf16.mxu0 %v1034_v55 }
 0x209   :  { %624 = vmatpush1.bf16.msra.mxu0 %v1032_v56 }
 0x20a   :  { %625 = vmatprep.subr.bf16.mxu0 %v1037_v57 }
 0x20d   :  { %626 = vmatpush1.bf16.msra.mxu0 %v1035_v58 }
 0x20e   :  { %627 = vmatprep.subr.bf16.mxu0 %v1040_v59 }
 0x211   :  { %628 = vmatpush1.bf16.msra.mxu0 %v1038_v60 }
 0x212   :  { %629 = vmatprep.subr.bf16.mxu0 %v1043_v61 }
 0x215   :  { %630 = vmatpush1.bf16.msra.mxu0 %v1041_v62 }
 0x216   :  { %631 = vmatprep.subr.bf16.mxu0 %v1046_v63 }
 0x219   :  { %632 = vmatpush1.bf16.msra.mxu0 %v1044_v0 }
 0x21a   :  { %633 = vmatprep.subr.bf16.mxu0 %v1049_v1 }
 0x21d   :  { %634 = vmatpush1.bf16.msra.mxu0 %v1047_v2  ;;  %v688_v2 = vld [vmem:[#allocation7 + $0x5] ss:$0 sm:$0xff] }
 0x21e   :  { %635 = vmatprep.subr.bf16.mxu0 %v1052_v3 }
 0x221   :  { %636 = vmatpush1.bf16.msra.mxu0 %v1050_v4 }
 0x222   :  { %637 = vmatprep.subr.bf16.mxu0 %v1055_v5 }
 0x225   :  { %638 = vmatpush1.bf16.msra.mxu0 %v1053_v6 }
 0x226   :  { %639 = vmatprep.subr.bf16.mxu0 %v1058_v15 }
 0x229   :  { %640 = vmatpush1.bf16.msra.mxu0 %v1056_v16 }
 0x22a   :  { %641 = vmatprep.subr.bf16.mxu0 %v1061_v17 }
 0x22d   :  { %642 = vmatpush1.bf16.msra.mxu0 %v1059_v18 }
 0x2c3   :  { %v244_v8 = vpop.f32.mrb[0].mxu0 }
 0x2c4   :  { %v245_v9 = vadd.f32 %v244_v8, %v181_v7  ;;  %v972_v10 = vpop.f32.mrb[1].mxu0 }
 0x2c5   :  { %v247_v11 = vpop.f32.mrb[2].mxu0 }
 0x2c6   :  { %v250_v12 = vmax.f32 %v245_v9, 0.0  ;;  %v973_v13 = vpop.f32.mrb[3].mxu0 }
 0x2c8   :  { %v251_v14 = vpack.c.bf16 %v250_v12, %v250_v12 }
 0x2ca   :  { %394 = vmatmul.mubr.bf16.vlgmr.msra.gmra.mrb[8].mxu1 %v251_v14 }
 0x2cb   :  { %927 = vmatpush3.bf16.msra.mxu1 %v1063_v20 }
 0x2cc   :  { %928 = vmatprep.subr.bf16.mxu1 %v1064_v21 }
 0x2cf   :  { %929 = vmatpush3.bf16.msra.mxu1 %v1065_v22 }
 0x2d0   :  { %930 = vmatprep.subr.bf16.mxu1 %v1066_v23 }
 0x2d3   :  { %931 = vmatpush3.bf16.msra.mxu1 %v1067_v24 }
 0x2d4   :  { %932 = vmatprep.subr.bf16.mxu1 %v1068_v25 }
 0x2d7   :  { %933 = vmatpush3.bf16.msra.mxu1 %v1069_v26 }
 0x2d8   :  { %934 = vmatprep.subr.bf16.mxu1 %v1070_v27 }
 0x2db   :  { %935 = vmatpush3.bf16.msra.mxu1 %v1071_v28 }
 0x2dc   :  { %936 = vmatprep.subr.bf16.mxu1 %v1072_v29 }
 0x2df   :  { %937 = vmatpush3.bf16.msra.mxu1 %v1073_v30 }
 0x2e0   :  { %938 = vmatprep.subr.bf16.mxu1 %v1074_v48 }
 0x2e3   :  { %939 = vmatpush3.bf16.msra.mxu1 %v1075_v49 }
 0x2e4   :  { %940 = vmatprep.subr.bf16.mxu1 %v1076_v50 }
 0x2e7   :  { %941 = vmatpush3.bf16.msra.mxu1 %v1077_v51 }
 0x39d   :  { %v395_v38 = vpop.f32.mrb[8].mxu1 }
 0x39e   :  { %v396_v39 = vadd.f32 %v395_v38, %v274_v36  ;;  %v397_v40 = vpop.f32.mrb[9].mxu1 }
 0x39f   :  { %v398_v41 = vadd.f32 %v397_v40, %v278_v37  ;;  %v399_v42 = vpop.f32.mrb[10].mxu1 }
 0x3a0   :  { %v402_v43 = vmax.f32 %v396_v39, 0.0  ;;  %v400_v44 = vpop.f32.mrb[11].mxu1 }
 0x3a1   :  { %v403_v45 = vmax.f32 %v398_v41, 0.0 }
 0x3a2   :  { %v404_v47 = vpack.c.bf16 %v402_v43, %v402_v43 }
 0x3a3   :  { %v405_v46 = vpack.c.bf16 %v403_v45, %v403_v45 }
 0x3a5   :  { %643 = vmatprep.mubr.bf16.mxu0 %v405_v46 }
 0x3a6   :  { %644 = vmatmul.mubr.bf16.vlgmr.msra.gmra.mrb[4].mxu0 %v404_v47 }
 0x479   :  { %v645_v55 = vpop.f32.mrb[4].mxu0 }
 0x47a   :  { %v646_v56 = vadd.f32 %v645_v55, %v444_v53  ;;  %v647_v57 = vpop.f32.mrb[5].mxu0 }
 0x47b   :  { %v648_v58 = vadd.f32 %v647_v57, %v448_v54  ;;  %v649_v59 = vpop.f32.mrb[6].mxu0 }
 0x47c   :  { %v652_v60 = vmax.f32 %v646_v56, 0.0  ;;  %v650_v61 = vpop.f32.mrb[7].mxu0 }
 0x47d   :  { %v653_v62 = vmax.f32 %v648_v58, 0.0 }
 0x47e   :  { %v654_v0 = vpack.c.bf16 %v652_v60, %v652_v60 }
 0x47f   :  { %v655_v63 = vpack.c.bf16 %v653_v62, %v653_v62 }
 0x481   :  { %817 = vmatprep.mubr.bf16.mxu1 %v655_v63 }
 0x482   :  { %818 = vmatmul.mubr.bf16.vlgmr.msra.gmra.mrb[12].mxu1 %v654_v0 }
 0x555   :  { %v942_v1 = vpop.f32.mrb[12].mxu1 }
 0x556   :  { %v943_v3 = vpop.f32.mrb[13].mxu1 }
 0x557   :  { %v944_v4 = vadd.f32 %v943_v3, %v942_v1  ;;  %v945_v5 = vpop.f32.mrb[14].mxu1 }
 0x558   :  { %v946_v6 = vpop.f32.mrb[15].mxu1 }
 0x559   :  { %v820_v7 = vadd.f32 %v944_v4, %v688_v2 }
 0x55b   :  { %825 = vst [vmem:[#allocation8] sm:$0xff] %v820_v7 }
 0x55c   :  { %1155 = shalt.err (!%p1152_p0)
}
 0x55d   :  { %s1156_s25 = scalar_lea.hbm %s1252_s3, 128 }
 0x55e   :  { %p1157_p1 = scmp.ne.s32.totalorder %s1252_s3, %s1156_s25  ;;  %p1160_p2 = scmp.lt.u32.totalorder %s1156_s25, %s1252_s3 }
 0x560   :  { %p1162_p3 = pnand %p1160_p2, %p1157_p1 }
 0x562   :  { %1165 = shalt.err (!%p1162_p3)
}
 0x563   :  { %835 = dma.vmem_to_hbm [thread:$0]  %s833_s21, 128, %s1252_s3, [#allocation4]  }
 0x564   :  { %1170 = dma.done.wait [#allocation4], 128  }
 0x565   :  { %1171 = vsyncadd [#allocation4], 4294967168 }
 0x566   :  { %839 = vsyncpa [#allocation3], 1 }
 0x567   :  { %840 = vsyncpa [#allocation6], 1 }
 0x568   :  { %841 = vsyncpa [#allocation4], 1 }

</bundles_post_ra>
